<compile_context>
chip_gen: v6e
topology: v6e:2x2x1
jax: 0.10.0
libtpu: 0.0.40
codegen_flags: <defaults>
</compile_context>

<pallas_src>
import functools

import jax
import jax.numpy as jnp
from jax.experimental import pallas as pl
from jax.experimental.pallas import tpu as pltpu


def _pick_row_tile(h, max_rows=512):
    """Largest row-strip height: full H if small, else a mult-of-8 divisor."""
    if h <= max_rows:
        return h
    start = max_rows - (max_rows % 8)
    for th in range(start, 7, -8):
        if h % th == 0:
            return th
    return h  # fallback: single full-height block


def _vflip_kernel(*refs):
    """Vertical flip (cv2.flip(img, 0)).

    The input BlockSpec already fetches the *mirrored* row strip, so the body
    only reverses rows within the strip.  Pure copies: no matmul, no casts.
    """
    n = len(refs) // 2
    for x_ref, o_ref in zip(refs[:n], refs[n:]):
        th = x_ref.shape[0]
        if th <= 64:
            # Small strip: build the reversed strip and do one dense store.
            x = x_ref[...]
            o_ref[...] = jnp.concatenate(
                [x[r:r + 1, :] for r in range(th - 1, -1, -1)], axis=0)
        else:
            # Large strip: loop of row copies (dynamic sublane slices).
            def body(r, _, x_ref=x_ref, o_ref=o_ref, th=th):
                o_ref[pl.ds(r, 1), :] = x_ref[pl.ds(th - 1 - r, 1), :]
                return 0
            jax.lax.fori_loop(0, th, body, 0)


def _hflip_kernel(*refs, widths, chans):
    """Horizontal flip (cv2.flip(img, 1)) on (rows, W*C)-folded planes.

    Reverses the W groups of C channels along the lane axis with static slices
    and a single lane-dense store per plane.
    """
    # TODO(synk): for very large W, tile the W axis via a mirrored index_map
    # instead of unrolling W static slices at trace time.
    n = len(refs) // 2
    for x_ref, o_ref, w, c in zip(refs[:n], refs[n:], widths, chans):
        x = x_ref[...]  # (row_strip, W*C)
        pieces = [x[:, j * c:(j + 1) * c] for j in range(w - 1, -1, -1)]
        o_ref[...] = jnp.concatenate(pieces, axis=1)


def flip_planes_pallas(planes, *, horizontal, widths, chans, max_rows=512):
    """Flip a tuple of (H, L)-folded planes in one pallas_call.

    planes[p] has shape (H, widths[p] * chans[p]); dtype is preserved.
    """
    planes = tuple(planes)
    h = planes[0].shape[0]
    th = _pick_row_tile(h, max_rows)
    nblk = h // th

    if horizontal:
        kernel = functools.partial(
            _hflip_kernel, widths=tuple(widths), chans=tuple(chans))
        in_idx = lambda i: (i, 0)                 # same strip in/out
    else:
        kernel = _vflip_kernel
        in_idx = lambda i: (nblk - 1 - i, 0)      # mirrored strip read (DMA-level flip)

    in_specs = [pl.BlockSpec((th, p.shape[1]), in_idx) for p in planes]
    out_specs = tuple(
        pl.BlockSpec((th, p.shape[1]), lambda i: (i, 0)) for p in planes)
    out_shape = tuple(jax.ShapeDtypeStruct(p.shape, p.dtype) for p in planes)

    return pl.pallas_call(
        kernel,
        out_shape=out_shape,
        grid=(nblk,),
        in_specs=in_specs,
        out_specs=out_specs,
        compiler_params=pltpu.CompilerParams(
            dimension_semantics=("parallel",)),
    )(*planes)


def random_flip(a_img, b_img, target, key, prob=0.5):
    """JAX/Pallas equivalent of RandomFlip.forward.

    a_img, b_img: (H, W, C) arrays; target: dict of (H, W) masks.
    Returns (a_img, b_img, target) flipped (or not), same shapes and dtypes.
    """
    k1, k2 = jax.random.split(key)
    do_flip = (jax.random.uniform(k1, ()) < prob).astype(jnp.int32)
    horiz = (jax.random.uniform(k2, ()) < 0.5).astype(jnp.int32)
    mode = do_flip * (1 + horiz)  # 0: no flip, 1: vertical, 2: horizontal

    tgt_keys = list(target.keys())
    planes = [a_img, b_img] + [target[k] for k in tgt_keys]
    shapes = [p.shape for p in planes]
    h = a_img.shape[0]
    widths = tuple(p.shape[1] for p in planes)
    chans = tuple(p.shape[2] if p.ndim == 3 else 1 for p in planes)

    # Free (row-major) fold of trailing dims so the lane axis is W*C.
    flat = tuple(p.reshape(h, -1) for p in planes)

    branches = [
        lambda ps: tuple(ps),                                                  # no flip
        lambda ps: tuple(flip_planes_pallas(
            ps, horizontal=False, widths=widths, chans=chans)),               # vertical
        lambda ps: tuple(flip_planes_pallas(
            ps, horizontal=True, widths=widths, chans=chans)),                # horizontal
    ]
    out_flat = jax.lax.switch(mode, branches, flat)

    outs = [o.reshape(s) for o, s in zip(out_flat, shapes)]
    a_out, b_out = outs[0], outs[1]
    tgt_out = {k: outs[2 + i] for i, k in enumerate(tgt_keys)}
    return a_out, b_out, tgt_out


if __name__ == "__main__":
    key = jax.random.PRNGKey(0)
    ka, kb, km, kflip = jax.random.split(key, 4)

    H = W = 16
    C = 4
    a_img = jax.random.normal(ka, (H, W, C), jnp.float32)
    b_img = jax.random.normal(kb, (H, W, C), jnp.float32)
    target = {"mask": jax.random.normal(km, (H, W), jnp.float32)}

    # 1) Direct kernel checks: both flip directions vs. jnp.flip.
    flat = (a_img.reshape(H, -1), b_img.reshape(H, -1),
            target["mask"].reshape(H, -1))
    widths = (W, W, W)
    chans = (C, C, 1)
    v = flip_planes_pallas(flat, horizontal=False, widths=widths, chans=chans)
    hz = flip_planes_pallas(flat, horizontal=True, widths=widths, chans=chans)
    jax.block_until_ready((v, hz))
    assert jnp.allclose(v[0].reshape(H, W, C), jnp.flip(a_img, axis=0))
    assert jnp.allclose(v[2].reshape(H, W), jnp.flip(target["mask"], axis=0))
    assert jnp.allclose(hz[1].reshape(H, W, C), jnp.flip(b_img, axis=1))
    assert jnp.allclose(hz[2].reshape(H, W), jnp.flip(target["mask"], axis=1))

    # 2) End-to-end RandomFlip.forward (random decision inside the wrapper).
    a_out, b_out, t_out = jax.jit(random_flip)(a_img, b_img, target, kflip)
    jax.block_until_ready((a_out, b_out, t_out["mask"]))

    # Pure-JAX reference for the same flag draw.
    k1, k2 = jax.random.split(kflip)
    do_flip = bool(jax.random.uniform(k1, ()) < 0.5)
    horiz = bool(jax.random.uniform(k2, ()) < 0.5)

    def ref_flip(x):
        if not do_flip:
            return x
        return jnp.flip(x, axis=1 if horiz else 0)  # cv2.flip(.,1)=W, (.,0)=H

    assert jnp.allclose(a_out, ref_flip(a_img))
    assert jnp.allclose(b_out, ref_flip(b_img))
    assert jnp.allclose(t_out["mask"], ref_flip(target["mask"]))

    print("KERNEL_OK")
</pallas_src>

<mosaic_0001>
module attributes {stable_mosaic.version = 11 : i64} {
  func.func @_vflip_kernel(%arg0: i32, %arg1: memref<16x64xf32, #tpu.memory_space<vmem>>, %arg2: memref<16x64xf32, #tpu.memory_space<vmem>>, %arg3: memref<16x16xf32, #tpu.memory_space<vmem>>, %arg4: memref<16x64xf32, #tpu.memory_space<vmem>>, %arg5: memref<16x64xf32, #tpu.memory_space<vmem>>, %arg6: memref<16x16xf32, #tpu.memory_space<vmem>>) attributes {dimension_semantics = [#tpu.dimension_semantics<parallel>], iteration_bounds = array<i64: 1>, scalar_prefetch = 0 : i64, scratch_operands = 0 : i64, tpu.core_type = #tpu.core_type<tc>, window_params = [{transform_indices = @transform_0, window_bounds = array<i64: 16, 64>}, {transform_indices = @transform_1, window_bounds = array<i64: 16, 64>}, {transform_indices = @transform_2, window_bounds = array<i64: 16, 16>}, {transform_indices = @transform_3, window_bounds = array<i64: 16, 64>}, {transform_indices = @transform_4, window_bounds = array<i64: 16, 64>}, {transform_indices = @transform_5, window_bounds = array<i64: 16, 16>}]} {
    %c0 = arith.constant 0 : index
    %c0_0 = arith.constant 0 : index
    %0 = vector.load %arg1[%c0, %c0_0] : memref<16x64xf32, #tpu.memory_space<vmem>>, vector<16x64xf32>
    %1 = vector.extract_strided_slice %0 {offsets = [15, 0], sizes = [1, 64], strides = [1, 1]} : vector<16x64xf32> to vector<1x64xf32>
    %2 = vector.extract_strided_slice %0 {offsets = [14, 0], sizes = [1, 64], strides = [1, 1]} : vector<16x64xf32> to vector<1x64xf32>
    %3 = vector.extract_strided_slice %0 {offsets = [13, 0], sizes = [1, 64], strides = [1, 1]} : vector<16x64xf32> to vector<1x64xf32>
    %4 = vector.extract_strided_slice %0 {offsets = [12, 0], sizes = [1, 64], strides = [1, 1]} : vector<16x64xf32> to vector<1x64xf32>
    %5 = vector.extract_strided_slice %0 {offsets = [11, 0], sizes = [1, 64], strides = [1, 1]} : vector<16x64xf32> to vector<1x64xf32>
    %6 = vector.extract_strided_slice %0 {offsets = [10, 0], sizes = [1, 64], strides = [1, 1]} : vector<16x64xf32> to vector<1x64xf32>
    %7 = vector.extract_strided_slice %0 {offsets = [9, 0], sizes = [1, 64], strides = [1, 1]} : vector<16x64xf32> to vector<1x64xf32>
    %8 = vector.extract_strided_slice %0 {offsets = [8, 0], sizes = [1, 64], strides = [1, 1]} : vector<16x64xf32> to vector<1x64xf32>
    %9 = vector.extract_strided_slice %0 {offsets = [7, 0], sizes = [1, 64], strides = [1, 1]} : vector<16x64xf32> to vector<1x64xf32>
    %10 = vector.extract_strided_slice %0 {offsets = [6, 0], sizes = [1, 64], strides = [1, 1]} : vector<16x64xf32> to vector<1x64xf32>
    %11 = vector.extract_strided_slice %0 {offsets = [5, 0], sizes = [1, 64], strides = [1, 1]} : vector<16x64xf32> to vector<1x64xf32>
    %12 = vector.extract_strided_slice %0 {offsets = [4, 0], sizes = [1, 64], strides = [1, 1]} : vector<16x64xf32> to vector<1x64xf32>
    %13 = vector.extract_strided_slice %0 {offsets = [3, 0], sizes = [1, 64], strides = [1, 1]} : vector<16x64xf32> to vector<1x64xf32>
    %14 = vector.extract_strided_slice %0 {offsets = [2, 0], sizes = [1, 64], strides = [1, 1]} : vector<16x64xf32> to vector<1x64xf32>
    %15 = vector.extract_strided_slice %0 {offsets = [1, 0], sizes = [1, 64], strides = [1, 1]} : vector<16x64xf32> to vector<1x64xf32>
    %16 = vector.extract_strided_slice %0 {offsets = [0, 0], sizes = [1, 64], strides = [1, 1]} : vector<16x64xf32> to vector<1x64xf32>
    %17 = tpu.concatenate %1, %2, %3, %4, %5, %6, %7, %8, %9, %10, %11, %12, %13, %14, %15, %16 in 0 : vector<1x64xf32>, vector<1x64xf32>, vector<1x64xf32>, vector<1x64xf32>, vector<1x64xf32>, vector<1x64xf32>, vector<1x64xf32>, vector<1x64xf32>, vector<1x64xf32>, vector<1x64xf32>, vector<1x64xf32>, vector<1x64xf32>, vector<1x64xf32>, vector<1x64xf32>, vector<1x64xf32>, vector<1x64xf32> -> vector<16x64xf32>
    %c0_1 = arith.constant 0 : index
    %c0_2 = arith.constant 0 : index
    %18 = vector.load %arg4[%c0_1, %c0_2] : memref<16x64xf32, #tpu.memory_space<vmem>>, vector<16x64xf32>
    tpu.vector_store %arg4[%c0_1, %c0_2], %17 {strides = array<i32>} : memref<16x64xf32, #tpu.memory_space<vmem>>, vector<16x64xf32>,
    %c0_3 = arith.constant 0 : index
    %c0_4 = arith.constant 0 : index
    %19 = vector.load %arg2[%c0_3, %c0_4] : memref<16x64xf32, #tpu.memory_space<vmem>>, vector<16x64xf32>
    %20 = vector.extract_strided_slice %19 {offsets = [15, 0], sizes = [1, 64], strides = [1, 1]} : vector<16x64xf32> to vector<1x64xf32>
    %21 = vector.extract_strided_slice %19 {offsets = [14, 0], sizes = [1, 64], strides = [1, 1]} : vector<16x64xf32> to vector<1x64xf32>
    %22 = vector.extract_strided_slice %19 {offsets = [13, 0], sizes = [1, 64], strides = [1, 1]} : vector<16x64xf32> to vector<1x64xf32>
    %23 = vector.extract_strided_slice %19 {offsets = [12, 0], sizes = [1, 64], strides = [1, 1]} : vector<16x64xf32> to vector<1x64xf32>
    %24 = vector.extract_strided_slice %19 {offsets = [11, 0], sizes = [1, 64], strides = [1, 1]} : vector<16x64xf32> to vector<1x64xf32>
    %25 = vector.extract_strided_slice %19 {offsets = [10, 0], sizes = [1, 64], strides = [1, 1]} : vector<16x64xf32> to vector<1x64xf32>
    %26 = vector.extract_strided_slice %19 {offsets = [9, 0], sizes = [1, 64], strides = [1, 1]} : vector<16x64xf32> to vector<1x64xf32>
    %27 = vector.extract_strided_slice %19 {offsets = [8, 0], sizes = [1, 64], strides = [1, 1]} : vector<16x64xf32> to vector<1x64xf32>
    %28 = vector.extract_strided_slice %19 {offsets = [7, 0], sizes = [1, 64], strides = [1, 1]} : vector<16x64xf32> to vector<1x64xf32>
    %29 = vector.extract_strided_slice %19 {offsets = [6, 0], sizes = [1, 64], strides = [1, 1]} : vector<16x64xf32> to vector<1x64xf32>
    %30 = vector.extract_strided_slice %19 {offsets = [5, 0], sizes = [1, 64], strides = [1, 1]} : vector<16x64xf32> to vector<1x64xf32>
    %31 = vector.extract_strided_slice %19 {offsets = [4, 0], sizes = [1, 64], strides = [1, 1]} : vector<16x64xf32> to vector<1x64xf32>
    %32 = vector.extract_strided_slice %19 {offsets = [3, 0], sizes = [1, 64], strides = [1, 1]} : vector<16x64xf32> to vector<1x64xf32>
    %33 = vector.extract_strided_slice %19 {offsets = [2, 0], sizes = [1, 64], strides = [1, 1]} : vector<16x64xf32> to vector<1x64xf32>
    %34 = vector.extract_strided_slice %19 {offsets = [1, 0], sizes = [1, 64], strides = [1, 1]} : vector<16x64xf32> to vector<1x64xf32>
    %35 = vector.extract_strided_slice %19 {offsets = [0, 0], sizes = [1, 64], strides = [1, 1]} : vector<16x64xf32> to vector<1x64xf32>
    %36 = tpu.concatenate %20, %21, %22, %23, %24, %25, %26, %27, %28, %29, %30, %31, %32, %33, %34, %35 in 0 : vector<1x64xf32>, vector<1x64xf32>, vector<1x64xf32>, vector<1x64xf32>, vector<1x64xf32>, vector<1x64xf32>, vector<1x64xf32>, vector<1x64xf32>, vector<1x64xf32>, vector<1x64xf32>, vector<1x64xf32>, vector<1x64xf32>, vector<1x64xf32>, vector<1x64xf32>, vector<1x64xf32>, vector<1x64xf32> -> vector<16x64xf32>
    %c0_5 = arith.constant 0 : index
    %c0_6 = arith.constant 0 : index
    %37 = vector.load %arg5[%c0_5, %c0_6] : memref<16x64xf32, #tpu.memory_space<vmem>>, vector<16x64xf32>
    tpu.vector_store %arg5[%c0_5, %c0_6], %36 {strides = array<i32>} : memref<16x64xf32, #tpu.memory_space<vmem>>, vector<16x64xf32>,
    %c0_7 = arith.constant 0 : index
    %c0_8 = arith.constant 0 : index
    %38 = vector.load %arg3[%c0_7, %c0_8] : memref<16x16xf32, #tpu.memory_space<vmem>>, vector<16x16xf32>
    %39 = vector.extract_strided_slice %38 {offsets = [15, 0], sizes = [1, 16], strides = [1, 1]} : vector<16x16xf32> to vector<1x16xf32>
    %40 = vector.extract_strided_slice %38 {offsets = [14, 0], sizes = [1, 16], strides = [1, 1]} : vector<16x16xf32> to vector<1x16xf32>
    %41 = vector.extract_strided_slice %38 {offsets = [13, 0], sizes = [1, 16], strides = [1, 1]} : vector<16x16xf32> to vector<1x16xf32>
    %42 = vector.extract_strided_slice %38 {offsets = [12, 0], sizes = [1, 16], strides = [1, 1]} : vector<16x16xf32> to vector<1x16xf32>
    %43 = vector.extract_strided_slice %38 {offsets = [11, 0], sizes = [1, 16], strides = [1, 1]} : vector<16x16xf32> to vector<1x16xf32>
    %44 = vector.extract_strided_slice %38 {offsets = [10, 0], sizes = [1, 16], strides = [1, 1]} : vector<16x16xf32> to vector<1x16xf32>
    %45 = vector.extract_strided_slice %38 {offsets = [9, 0], sizes = [1, 16], strides = [1, 1]} : vector<16x16xf32> to vector<1x16xf32>
    %46 = vector.extract_strided_slice %38 {offsets = [8, 0], sizes = [1, 16], strides = [1, 1]} : vector<16x16xf32> to vector<1x16xf32>
    %47 = vector.extract_strided_slice %38 {offsets = [7, 0], sizes = [1, 16], strides = [1, 1]} : vector<16x16xf32> to vector<1x16xf32>
    %48 = vector.extract_strided_slice %38 {offsets = [6, 0], sizes = [1, 16], strides = [1, 1]} : vector<16x16xf32> to vector<1x16xf32>
    %49 = vector.extract_strided_slice %38 {offsets = [5, 0], sizes = [1, 16], strides = [1, 1]} : vector<16x16xf32> to vector<1x16xf32>
    %50 = vector.extract_strided_slice %38 {offsets = [4, 0], sizes = [1, 16], strides = [1, 1]} : vector<16x16xf32> to vector<1x16xf32>
    %51 = vector.extract_strided_slice %38 {offsets = [3, 0], sizes = [1, 16], strides = [1, 1]} : vector<16x16xf32> to vector<1x16xf32>
    %52 = vector.extract_strided_slice %38 {offsets = [2, 0], sizes = [1, 16], strides = [1, 1]} : vector<16x16xf32> to vector<1x16xf32>
    %53 = vector.extract_strided_slice %38 {offsets = [1, 0], sizes = [1, 16], strides = [1, 1]} : vector<16x16xf32> to vector<1x16xf32>
    %54 = vector.extract_strided_slice %38 {offsets = [0, 0], sizes = [1, 16], strides = [1, 1]} : vector<16x16xf32> to vector<1x16xf32>
    %55 = tpu.concatenate %39, %40, %41, %42, %43, %44, %45, %46, %47, %48, %49, %50, %51, %52, %53, %54 in 0 : vector<1x16xf32>, vector<1x16xf32>, vector<1x16xf32>, vector<1x16xf32>, vector<1x16xf32>, vector<1x16xf32>, vector<1x16xf32>, vector<1x16xf32>, vector<1x16xf32>, vector<1x16xf32>, vector<1x16xf32>, vector<1x16xf32>, vector<1x16xf32>, vector<1x16xf32>, vector<1x16xf32>, vector<1x16xf32> -> vector<16x16xf32>
    %c0_9 = arith.constant 0 : index
    %c0_10 = arith.constant 0 : index
    %56 = vector.load %arg6[%c0_9, %c0_10] : memref<16x16xf32, #tpu.memory_space<vmem>>, vector<16x16xf32>
    tpu.vector_store %arg6[%c0_9, %c0_10], %55 {strides = array<i32>} : memref<16x16xf32, #tpu.memory_space<vmem>>, vector<16x16xf32>,
    return
  }
  func.func @transform_0(%arg0: i32) -> (i32, i32) {
    %c0_i32 = arith.constant 0 : i32
    %0 = arith.subi %c0_i32, %arg0 : i32
    %c0_i32_0 = arith.constant 0 : i32
    %c0_i32_1 = arith.constant 0 : i32
    return %0, %c0_i32_0 : i32, i32
  }
  func.func @transform_1(%arg0: i32) -> (i32, i32) {
    %c0_i32 = arith.constant 0 : i32
    %0 = arith.subi %c0_i32, %arg0 : i32
    %c0_i32_0 = arith.constant 0 : i32
    %c0_i32_1 = arith.constant 0 : i32
    return %0, %c0_i32_0 : i32, i32
  }
  func.func @transform_2(%arg0: i32) -> (i32, i32) {
    %c0_i32 = arith.constant 0 : i32
    %0 = arith.subi %c0_i32, %arg0 : i32
    %c0_i32_0 = arith.constant 0 : i32
    %c0_i32_1 = arith.constant 0 : i32
    return %0, %c0_i32_0 : i32, i32
  }
  func.func @transform_3(%arg0: i32) -> (i32, i32) {
    %c0_i32 = arith.constant 0 : i32
    %c0_i32_0 = arith.constant 0 : i32
    return %arg0, %c0_i32 : i32, i32
  }
  func.func @transform_4(%arg0: i32) -> (i32, i32) {
    %c0_i32 = arith.constant 0 : i32
    %c0_i32_0 = arith.constant 0 : i32
    return %arg0, %c0_i32 : i32, i32
  }
  func.func @transform_5(%arg0: i32) -> (i32, i32) {
    %c0_i32 = arith.constant 0 : i32
    %c0_i32_0 = arith.constant 0 : i32
    return %arg0, %c0_i32 : i32, i32
  }
}

</mosaic_0001>

<bundles_post_ra>
// kernel: tpu_custom_call.1
= control target key start
LH: loop header
LB: loop body
LE: loop exit
PB: predicated region body
PF: predicated region fallthrough
CT: control target
= control target key end

     0   :  { %11 = vsyncpa [#allocation3], 0  ;;  %s518_s0 = inlined_call_operand.hbm [shape: f32[16,64], index: 0, kind: input, shape index: {}]   ;;  %s519_s1 = inlined_call_operand.hbm [shape: f32[16,64], index: 1, kind: input, shape index: {}]   ;;  %s520_s2 = inlined_call_operand.hbm [shape: f32[16,16], index: 2, kind: input, shape index: {}]   ;;  %s521_s3 = inlined_call_operand.hbm [shape: f32[16,64], index: 3, kind: output, shape index: {0}]   ;;  %s522_s4 = inlined_call_operand.hbm [shape: f32[16,64], index: 4, kind: output, shape index: {1}]   ;;  %s523_s5 = inlined_call_operand.hbm [shape: f32[16,16], index: 5, kind: output, shape index: {2}]  }
   0x1   :  { %12 = vsyncpa [#allocation6], 0 }
   0x2   :  { %13 = vsyncpa [#allocation4], 0 }
   0x3   :  { %14 = vsyncpa [#allocation10], 0  ;;  %s386_s18 = smov [#allocation5]   ;;  %s387_s20 = smov [#allocation2]  }
   0x4   :  { %s40_s19 = sshll.u32 %s386_s18, 4  ;;  %s24_s21 = sshll.u32 %s387_s20, 4  ;;  %s41_s19 = int_to_ptr.vmem [resolvable:$true] %s40_s19  ;;  %s25_s21 = int_to_ptr.vmem [resolvable:$true] %s24_s21 }
   0x5   :  { %s266_s22 = scalar_lea.vmem %s41_s19, 256  ;;  %p271_p1 = scmp.lt.s32.totalorder %s41_s19, %s41_s19 }
   0x6   :  { %p267_p0 = scmp.ne.s32.totalorder %s41_s19, %s266_s22  ;;  %p272_p2 = scmp.lt.s32.totalorder %s266_s22, %s266_s22 }
   0x8   :  { %p273_p3 = por %p272_p2, %p271_p1 }
   0xa   :  { %p274_p4 = pnand %p273_p3, %p267_p0 }
   0xc   :  { %277 = shalt.err (!%p274_p4)
}
   0xd   :  { %s388_s23 = smov 128   ;;  %s389_s24 = smov 8  }
   0xe   :  { %46 = dma.hbm_to_vmem [thread:$0]  %s519_s1, 256, %s41_s19, [#allocation6], %s388_s23, %s388_s23, %s389_s24  }
   0xf   :  { %s286_s27 = scalar_lea.vmem %s25_s21, 256  ;;  %p291_p6 = scmp.lt.s32.totalorder %s25_s21, %s25_s21 }
  0x10   :  { %p287_p5 = scmp.ne.s32.totalorder %s25_s21, %s286_s27  ;;  %p292_p7 = scmp.lt.s32.totalorder %s286_s27, %s286_s27 }
  0x12   :  { %p293_p8 = por %p292_p7, %p291_p6 }
  0x14   :  { %p294_p9 = pnand %p293_p8, %p287_p5 }
  0x16   :  { %297 = shalt.err (!%p294_p9)
}
  0x17   :  { %30 = dma.hbm_to_vmem [thread:$0]  %s518_s0, 256, %s25_s21, [#allocation3], %s388_s23, %s388_s23, %s389_s24  }
  0x18   :  { %s390_s30 = smov [#allocation7]  }
  0x19   :  { %s56_s6 = sshll.u32 %s390_s30, 4  ;;  %s57_s6 = int_to_ptr.vmem [resolvable:$true] %s56_s6 }
  0x1a   :  { %s306_s7 = scalar_lea.vmem %s57_s6, 256  ;;  %p311_p11 = scmp.lt.s32.totalorder %s57_s6, %s57_s6 }
  0x1b   :  { %p307_p10 = scmp.ne.s32.totalorder %s57_s6, %s306_s7  ;;  %p312_p12 = scmp.lt.s32.totalorder %s306_s7, %s306_s7 }
  0x1d   :  { %p313_p13 = por %p312_p12, %p311_p11 }
  0x1f   :  { %p314_p0 = pnand %p313_p13, %p307_p10 }
  0x21   :  { %317 = shalt.err (!%p314_p0)
}
  0x22   :  { %62 = dma.hbm_to_vmem [thread:$0]  %s520_s2, 256, %s57_s6, [#allocation6], %s388_s23, %s388_s23, %s389_s24  }
  0x23   :  { %378 = dma.done.wait [#allocation3], 256  }
  0x24   :  { %379 = vsyncadd [#allocation3], 4294967040 }
  0x25   :  { %380 = dma.done.wait [#allocation6], 512  }
  0x26   :  { %381 = vsyncadd [#allocation6], 4294966784  ;;  %vm98_vm0 = vcmask 1040384   ;;  %vm100_vm1 = vcmask 1041408   ;;  %vm102_vm2 = vcmask 1042432   ;;  %vm104_vm3 = vcmask 1043456  }
  0x27   :  { %vm106_vm4 = vcmask 1044480   ;;  %vm108_vm5 = vcmask 1045504   ;;  %vm110_vm6 = vcmask 1046528   ;;  %vm119_vm7 = vcmask 523264   ;;  %v123_v0 = vld [vmem:[#allocation5 + $0x8] sm:$0xff]  ;;  %v122_v1 = vld [vmem:[#allocation5] sm:$0xff] }
  0x28   :  { %v79_v2 = vld [vmem:[#allocation2 + $0x8] sm:$0xff]  ;;  %v125_v3 = vrot.slane %v123_v0, 7  ;;  %v127_v4 = vrot.slane %v123_v0, 5  ;;  %v129_v5 = vrot.slane %v123_v0, 3  ;;  %v131_v6 = vrot.slane %v123_v0, 1  ;;  %v442_v7 = vld [vmem:[#allocation2] sm:$0xff] }
  0x29   :  { %v134_v8 = vrot.slane %v122_v1, 7  ;;  %v136_v9 = vrot.slane %v122_v1, 5  ;;  %v138_v10 = vrot.slane %v122_v1, 3  ;;  %v140_v11 = vrot.slane %v122_v1, 1  ;;  %s391_s0 = smov [#allocation9]   ;;  %v460_v32 = vld [vmem:[#allocation7 + $0x8] sm:$0xff] }
  0x2a   :  { %v142_v12 = vsel %vm98_vm0, %v125_v3, %v127_v4  ;;  %v81_v13 = vrot.slane %v79_v2, 7  ;;  %v83_v14 = vrot.slane %v79_v2, 5  ;;  %v85_v15 = vrot.slane %v79_v2, 3  ;;  %s212_s2 = sshll.u32 %s391_s0, 4  ;;  %v158_v41 = vld [vmem:[#allocation7] sm:$0xff]  ;;  %s392_s9 = smov [#allocation8]   ;;  %s213_s2 = int_to_ptr.vmem [resolvable:$true] %s212_s2 }
  0x2b   :  { %v143_v16 = vsel %vm100_vm1, %v142_v12, %v129_v5  ;;  %v149_v17 = vsel %vm98_vm0, %v134_v8, %v136_v9  ;;  %v87_v18 = vrot.slane %v79_v2, 1  ;;  %v90_v19 = vrot.slane %v442_v7, 7  ;;  %s200_s10 = sshll.u32 %s392_s9, 4  ;;  %s318_s11 = scalar_lea.vmem %s213_s2, 256  ;;  %s201_s10 = int_to_ptr.vmem [resolvable:$true] %s200_s10 }
  0x2c   :  { %v144_v20 = vsel %vm102_vm2, %v143_v16, %v131_v6  ;;  %v150_v21 = vsel %vm100_vm1, %v149_v17, %v138_v10  ;;  %v99_v22 = vsel %vm98_vm0, %v81_v13, %v83_v14  ;;  %v92_v23 = vrot.slane %v442_v7, 5  ;;  %p319_p1 = scmp.ne.s32.totalorder %s213_s2, %s318_s11  ;;  %p323_p2 = scmp.lt.s32.totalorder %s213_s2, %s213_s2 }
  0x2d   :  { %v145_v24 = vsel %vm104_vm3, %v144_v20, %v125_v3  ;;  %v151_v25 = vsel %vm102_vm2, %v150_v21, %v140_v11  ;;  %v101_v26 = vsel %vm100_vm1, %v99_v22, %v85_v15  ;;  %v94_v27 = vrot.slane %v442_v7, 3  ;;  %p324_p3 = scmp.lt.s32.totalorder %s318_s11, %s318_s11 }
  0x2e   :  { %v146_v28 = vsel %vm106_vm4, %v145_v24, %v127_v4  ;;  %v152_v29 = vsel %vm104_vm3, %v151_v25, %v134_v8  ;;  %v103_v30 = vsel %vm102_vm2, %v101_v26, %v87_v18  ;;  %v96_v31 = vrot.slane %v442_v7, 1 }
  0x2f   :  { %v147_v33 = vsel %vm108_vm5, %v146_v28, %v129_v5  ;;  %v153_v34 = vsel %vm106_vm4, %v152_v29, %v136_v9  ;;  %v105_v35 = vsel %vm104_vm3, %v103_v30, %v81_v13  ;;  %v112_v36 = vsel %vm98_vm0, %v90_v19, %v92_v23  ;;  %p325_p4 = por %p324_p3, %p323_p2 }
  0x30   :  { %v148_v37 = vsel %vm110_vm6, %v147_v33, %v131_v6  ;;  %v154_v38 = vsel %vm108_vm5, %v153_v34, %v138_v10  ;;  %v107_v39 = vsel %vm106_vm4, %v105_v35, %v83_v14  ;;  %v113_v40 = vsel %vm100_vm1, %v112_v36, %v94_v27 }
  0x31   :  { %156 = vst.msk [vmem:[#allocation9] sm:$0xff] %vm119_vm7, %v148_v37  ;;  %v155_v42 = vsel %vm110_vm6, %v154_v38, %v140_v11  ;;  %v109_v43 = vsel %vm108_vm5, %v107_v39, %v85_v15  ;;  %v114_v44 = vsel %vm102_vm2, %v113_v40, %v96_v31  ;;  %v161_v45 = vrot.slane %v460_v32, 7  ;;  %p326_p5 = pnand %p325_p4, %p319_p1 }
  0x32   :  { %157 = vst.msk [vmem:[#allocation9 + $0x8] sm:$0xff] %vm119_vm7, %v155_v42  ;;  %v111_v46 = vsel %vm110_vm6, %v109_v43, %v87_v18  ;;  %v115_v47 = vsel %vm104_vm3, %v114_v44, %v90_v19  ;;  %v163_v48 = vrot.slane %v460_v32, 5  ;;  %v165_v49 = vrot.slane %v460_v32, 3 }
  0x33   :  { %120 = vst.msk [vmem:[#allocation8] sm:$0xff] %vm119_vm7, %v111_v46  ;;  %v116_v50 = vsel %vm106_vm4, %v115_v47, %v92_v23  ;;  %v167_v51 = vrot.slane %v460_v32, 1  ;;  %v170_v52 = vrot.slane %v158_v41, 7  ;;  %v172_v53 = vrot.slane %v158_v41, 5 }
  0x34   :  { %329 = shalt.err (!%p326_p5)
}
  0x35   :  { %218 = dma.vmem_to_hbm [thread:$0]  %s213_s2, 256, %s522_s4, [#allocation10], %s388_s23, %s388_s23, %s389_s24   ;;  %v117_v54 = vsel %vm108_vm5, %v116_v50, %v94_v27  ;;  %v178_v55 = vsel %vm98_vm0, %v161_v45, %v163_v48  ;;  %v174_v56 = vrot.slane %v158_v41, 3  ;;  %v176_v57 = vrot.slane %v158_v41, 1 }
  0x36   :  { %v118_v58 = vsel %vm110_vm6, %v117_v54, %v96_v31  ;;  %v179_v59 = vsel %vm100_vm1, %v178_v55, %v165_v49  ;;  %v185_v60 = vsel %vm98_vm0, %v170_v52, %v172_v53  ;;  %s393_s4 = smov [#allocation11]   ;;  %s338_s15 = scalar_lea.vmem %s201_s10, 256 }
  0x37   :  { %121 = vst.msk [vmem:[#allocation8 + $0x8] sm:$0xff] %vm119_vm7, %v118_v58  ;;  %v180_v61 = vsel %vm102_vm2, %v179_v59, %v167_v51  ;;  %v186_v62 = vsel %vm100_vm1, %v185_v60, %v174_v56  ;;  %s224_s14 = sshll.u32 %s393_s4, 4  ;;  %p339_p6 = scmp.ne.s32.totalorder %s201_s10, %s338_s15  ;;  %s225_s14 = int_to_ptr.vmem [resolvable:$true] %s224_s14 }
  0x38   :  { %v181_v63 = vsel %vm104_vm3, %v180_v61, %v161_v45  ;;  %v187_v0 = vsel %vm102_vm2, %v186_v62, %v176_v57  ;;  %p343_p7 = scmp.lt.s32.totalorder %s201_s10, %s201_s10  ;;  %p344_p8 = scmp.lt.s32.totalorder %s338_s15, %s338_s15 }
  0x3a   :  { %p345_p9 = por %p344_p8, %p343_p7 }
  0x3c   :  { %p346_p10 = pnand %p345_p9, %p339_p6 }
  0x3e   :  { %349 = shalt.err (!%p346_p10)
}
  0x3f   :  { %206 = dma.vmem_to_hbm [thread:$0]  %s201_s10, 256, %s521_s3, [#allocation4], %s388_s23, %s388_s23, %s389_s24   ;;  %v182_v1 = vsel %vm106_vm4, %v181_v63, %v163_v48  ;;  %vm192_vm8 = vcmask 130048   ;;  %v188_v2 = vsel %vm104_vm3, %v187_v0, %v170_v52 }
  0x40   :  { %v183_v3 = vsel %vm108_vm5, %v182_v1, %v165_v49  ;;  %v189_v4 = vsel %vm106_vm4, %v188_v2, %v172_v53  ;;  %s358_s18 = scalar_lea.vmem %s225_s14, 256  ;;  %p363_p12 = scmp.lt.s32.totalorder %s225_s14, %s225_s14 }
  0x41   :  { %v184_v5 = vsel %vm110_vm6, %v183_v3, %v167_v51  ;;  %v190_v6 = vsel %vm108_vm5, %v189_v4, %v174_v56  ;;  %p359_p11 = scmp.ne.s32.totalorder %s225_s14, %s358_s18  ;;  %p364_p13 = scmp.lt.s32.totalorder %s358_s18, %s358_s18 }
  0x42   :  { %193 = vst.msk [vmem:[#allocation11] sm:$0xff] %vm192_vm8, %v184_v5  ;;  %v191_v7 = vsel %vm110_vm6, %v190_v6, %v176_v57 }
  0x43   :  { %194 = vst.msk [vmem:[#allocation11 + $0x8] sm:$0xff] %vm192_vm8, %v191_v7  ;;  %p365_p0 = por %p364_p13, %p363_p12 }
  0x45   :  { %p366_p1 = pnand %p365_p0, %p359_p11 }
  0x47   :  { %369 = shalt.err (!%p366_p1)
}
  0x48   :  { %230 = dma.vmem_to_hbm [thread:$0]  %s225_s14, 256, %s523_s5, [#allocation10], %s388_s23, %s388_s23, %s389_s24  }
  0x49   :  { %382 = dma.done.wait [#allocation4], 256  }
  0x4a   :  { %383 = vsyncadd [#allocation4], 4294967040 }
  0x4b   :  { %384 = dma.done.wait [#allocation10], 512  }
  0x4c   :  { %385 = vsyncadd [#allocation10], 4294966784 }
  0x4d   :  { %240 = vsyncpa [#allocation3], 1 }
  0x4e   :  { %241 = vsyncpa [#allocation6], 1 }
  0x4f   :  { %242 = vsyncpa [#allocation4], 1 }
  0x50   :  { %243 = vsyncpa [#allocation10], 1 }

</bundles_post_ra>
